<compile_context>
chip_gen: v5e
topology: v5e:2x2
jax: 0.10.0
libtpu: 0.0.40
codegen_flags: <defaults>
</compile_context>

<pallas_src>
import functools

import jax
import jax.numpy as jnp
from jax.experimental import pallas as pl
from jax.experimental.pallas import tpu as pltpu


# ----------------------------------------------------------------------------
# Helpers: padded-tile VMEM accounting + TPU-generation detection.
# ----------------------------------------------------------------------------
def _round_up(x, m):
    return ((x + m - 1) // m) * m


def _sublane(dtype):
    # Sublane multiple of the (sublane, 128) vreg tiling:
    # 8 for 32-bit, 16 for 16-bit, 32 for 8-bit dtypes.
    return max(8, 32 // jnp.dtype(dtype).itemsize)


def _padded_block_bytes(rows, cols, dtype):
    """Bytes one (rows, cols) slab actually occupies in VMEM after (sublane,
    128) tile padding — raw byte counts under-estimate by 4-16x for small
    graph dims / narrow feature widths."""
    d = jnp.dtype(dtype)
    return (_round_up(max(rows, 1), _sublane(d))
            * _round_up(max(cols, 1), 128) * d.itemsize)


def _tpu_vmem_capacity_bytes():
    try:
        return int(pltpu.get_tpu_info().vmem_capacity_bytes)
    except Exception:
        return 64 << 20  # conservative fallback = smallest generation (v7x)


def _has_two_tensorcores(phys_vmem_bytes):
    try:
        if "v7" in jax.devices()[0].device_kind.lower():
            return True
    except Exception:
        pass
    # v7x is also the only small-VMEM generation; when detection falls back we
    # conservatively behave as if there are 2 TensorCores (harmless elsewhere).
    return phys_vmem_bytes <= (64 << 20)


# ----------------------------------------------------------------------------
# Fused Pallas kernel: both boundary reductions in a single pass.
# ----------------------------------------------------------------------------
def _fused_reduce_kernel(e_adj_ref, x_ref, c_adj_ref, rex_ref, cxd_ref, *,
                         cell_scale):
    """Per batch tile:
         rex = e_adj @ dense_vx             (edge features, InitReduceConv('add'))
         cxd = cell_scale * (c_adj @ rex)   ('/ 2.0' fused as a compile-time scale)
       `rex` stays in VMEM/registers between the two matmuls (no HBM trip) and
       is kept in f32 for the second matmul (no precision loss)."""
    x = x_ref[...]
    e_adj = e_adj_ref[...]
    if e_adj.dtype != x.dtype:            # bf16 0/1 adjacency -> cheap VPU upcast;
        e_adj = e_adj.astype(x.dtype)     # features stay full precision.
    # TODO(synk): for realistic sparsity (2-4 nnz/row) replace the dense matmul
    # with a scalar-prefetched index-gather + VPU add (PrefetchScalarGridSpec).
    # TODO(synk): pack (batch_tile*Ne) rows into one block-diagonal matmul to
    # raise MXU M-occupancy on v6e/v7x (256x256 MXU) for large graphs.
    rex = jnp.einsum("bij,bjf->bif", e_adj, x,
                     preferred_element_type=jnp.float32)
    rex_ref[...] = rex.astype(rex_ref.dtype)

    c_adj = c_adj_ref[...]
    if c_adj.dtype != rex.dtype:
        c_adj = c_adj.astype(rex.dtype)
    cxd = jnp.einsum("bij,bjf->bif", c_adj, rex,
                     preferred_element_type=jnp.float32)
    if cell_scale != 1.0:  # skip the VPU multiply at trace time when scale == 1
        cxd = cxd * cell_scale
    cxd_ref[...] = cxd.astype(cxd_ref.dtype)


def fused_boundary_reduce(e_boundary_adj, dense_vx, c_boundary_adj, *,
                          cell_scale=0.5, batch_tile=None):
    """InitReduceConv('add') applied twice, fused into one pallas_call.

        reduced_ex = e_boundary_adj @ dense_vx                    (B, Ne, F)
        dense_cx   = cell_scale * (c_boundary_adj @ reduced_ex)   (B, Nc, F)

    e_boundary_adj : (B, Ne, Nv)  float (bf16 0/1 recommended, materialized upstream)
    dense_vx       : (B, Nv, F)   float (F ideally already a multiple of 128)
    c_boundary_adj : (B, Nc, Ne)  float
    """
    B, Ne, Nv = e_boundary_adj.shape
    Bx, Nv2, F = dense_vx.shape
    Bc, Nc, Ne2 = c_boundary_adj.shape
    assert B == Bx == Bc and Nv == Nv2 and Ne == Ne2

    out_dtype = dense_vx.dtype

    # Lane-dense feature axis: every output store becomes an unmasked `vst` and
    # feature vregs use all 128 lanes. Callers that build dense_vx already
    # padded (see embed_ve_with_reduce_forward) skip this extra pad/slice pass.
    F_pad = _round_up(F, 128)
    if F_pad != F:
        dense_vx = jnp.pad(dense_vx, ((0, 0), (0, 0), (0, F_pad - F)))

    # ---- generation-aware VMEM budget, sized from PADDED tile footprints ----
    phys = _tpu_vmem_capacity_bytes()
    two_tc = _has_two_tensorcores(phys)
    vmem_limit = (96 << 20) if phys >= (128 << 20) else (48 << 20)

    e_dt, x_dt, c_dt = (e_boundary_adj.dtype, dense_vx.dtype,
                        c_boundary_adj.dtype)
    io_bytes = (_padded_block_bytes(Ne, Nv, e_dt)
                + _padded_block_bytes(Nv, F_pad, x_dt)
                + _padded_block_bytes(Nc, Ne, c_dt)
                + _padded_block_bytes(Ne, F_pad, out_dtype)
                + _padded_block_bytes(Nc, F_pad, out_dtype))
    live_bytes = (_padded_block_bytes(Ne, F_pad, jnp.float32)   # rex (f32 acc)
                  + _padded_block_bytes(Nc, F_pad, jnp.float32)  # cxd (f32 acc)
                  + _padded_block_bytes(Ne, Nv, jnp.float32)     # upcast adj copies
                  + _padded_block_bytes(Nc, Ne, jnp.float32))
    per_batch = 2 * io_bytes + live_bytes   # 2x: double-buffered pipeline blocks

    budget = int(0.75 * vmem_limit)
    if per_batch > budget:
        # Even batch_tile=1 overflows the picked budget: raise the compiler
        # limit (within physical VMEM) instead of failing.
        vmem_limit = min(int(phys * 0.85), max(vmem_limit, int(per_batch / 0.7)))
        budget = int(0.75 * vmem_limit)
        # TODO(synk): row-tile Ne/Nc (K-reduction grid axis + f32 accumulator
        # scratch for the 2-cell matmul) so a single batch element's blocks
        # never have to fit VMEM whole on v7x.

    if batch_tile is None:
        batch_tile = max(1, min(B, budget // max(per_batch, 1)))
        while B % batch_tile:            # keep the grid exact (no ragged tile)
            batch_tile -= 1
        if two_tc and B >= 2:
            # Leave >=2 grid steps so dimension_semantics=("parallel",) can
            # actually occupy both TensorCores on v7x.
            batch_tile = min(batch_tile, B // 2)
            while B % batch_tile:
                batch_tile -= 1
    assert B % batch_tile == 0
    grid_b = B // batch_tile

    kernel = functools.partial(_fused_reduce_kernel,
                               cell_scale=float(cell_scale))
    rex, cxd = pl.pallas_call(
        kernel,
        out_shape=(
            jax.ShapeDtypeStruct((B, Ne, F_pad), out_dtype),
            jax.ShapeDtypeStruct((B, Nc, F_pad), out_dtype),
        ),
        grid=(grid_b,),
        in_specs=[
            pl.BlockSpec((batch_tile, Ne, Nv), lambda b: (b, 0, 0)),
            pl.BlockSpec((batch_tile, Nv, F_pad), lambda b: (b, 0, 0)),
            pl.BlockSpec((batch_tile, Nc, Ne), lambda b: (b, 0, 0)),
        ],
        out_specs=(
            pl.BlockSpec((batch_tile, Ne, F_pad), lambda b: (b, 0, 0)),
            pl.BlockSpec((batch_tile, Nc, F_pad), lambda b: (b, 0, 0)),
        ),
        compiler_params=pltpu.CompilerParams(
            # Batch tiles are independent -> megacore-shardable on v7x (2 TCs);
            # neutral (and safe) on v5e/v6e (1 TC).
            dimension_semantics=("parallel",),
            vmem_limit_bytes=int(vmem_limit),
        ),
    )(e_boundary_adj, dense_vx, c_boundary_adj)

    if F_pad != F:   # only taken for callers that did not pre-pad F
        rex = rex[..., :F]
        cxd = cxd[..., :F]
    return rex, cxd


# ----------------------------------------------------------------------------
# Forward pass (glue in plain JAX, fused hot path in Pallas)
# ----------------------------------------------------------------------------
def get_dense_x(x, x_mask, x_idx, feature_pad=0):
    """dense_x = zeros(mask.shape + x.shape[1:]); dense_x[x_idx] = x.
    `feature_pad` zero features are appended so the dense buffer is already
    lane-dense (multiple of 128) — the pad is fused into the single scatter
    instead of costing a separate HBM pass."""
    if feature_pad:
        x = jnp.pad(x, ((0, 0), (0, feature_pad)))
    dense_shape = tuple(x_mask.shape) + tuple(x.shape[1:])
    return jnp.zeros(dense_shape, x.dtype).at[x_idx].set(x)


def embed_ve_with_reduce_forward(
    v_table,                 # (V_VOCAB, F) embedding table
    v_x, v_x_mask, v_x_idx,  # vertex params
    e_boundary_adj, e_x_idx, # edge params (e_params.x is None)
    c_boundary_adj, c_x_idx, # 2-cell params
):
    # _prepare_v_inputs: (num_v, 1) int -> (num_v,) ids; v_embed_layer is a
    # table lookup -> direct row gather (pure DMA), not a one-hot matmul.
    v_ids = v_x[:, 0]
    vx = jnp.take(v_table, v_ids, axis=0)                  # (num_v, F)
    out = [vx]

    F = vx.shape[-1]
    F_pad = _round_up(F, 128)
    # Dense scatter of vertex embeddings into a lane-dense (B, Nv, F_pad)
    # buffer; the feature pad is fused into this one scatter.
    # TODO(synk): fold this scatter and the e_x_idx/c_x_idx output gathers into
    # the fused kernel via scalar-prefetched (batch, pos) indices to drop one
    # full HBM round-trip of dense_vx and the writes of padded-away rows.
    dense_vx = get_dense_x(vx, v_x_mask, v_x_idx, feature_pad=F_pad - F)

    # Both boundary reductions in ONE fused Pallas kernel; the "/ 2.0" of the
    # 2-cell branch is fused as a compile-time scale.
    reduced_ex, dense_cx = fused_boundary_reduce(
        e_boundary_adj, dense_vx, c_boundary_adj, cell_scale=0.5)

    ex = reduced_ex[e_x_idx]                                # e_params.x is None
    cx = dense_cx[c_x_idx]
    if F_pad != F:                                          # drop the lane padding
        ex = ex[:, :F]
        cx = cx[:, :F]
    out.append(ex)
    out.append(cx)
    return out


# ----------------------------------------------------------------------------
# Example data + reference check
# ----------------------------------------------------------------------------
if __name__ == "__main__":
    key = jax.random.PRNGKey(0)
    B, NV_MAX, NE_MAX, NC_MAX = 2, 8, 8, 4
    F, V_VOCAB = 32, 10

    k_tab, k_ids = jax.random.split(key)

    # Deterministic "parameters" (the v_embed_layer embedding table).
    v_table = jax.random.normal(k_tab, (V_VOCAB, F), dtype=jnp.float32)

    # Vertices: graph 0 has 7, graph 1 has 5.
    num_v0, num_v1 = 7, 5
    v_batch = jnp.array([0] * num_v0 + [1] * num_v1, dtype=jnp.int32)
    v_pos = jnp.concatenate([jnp.arange(num_v0), jnp.arange(num_v1)]).astype(jnp.int32)
    v_x_idx = (v_batch, v_pos)
    v_x = jax.random.randint(k_ids, (num_v0 + num_v1, 1), 0, V_VOCAB, dtype=jnp.int32)
    v_x_mask = jnp.zeros((B, NV_MAX), dtype=bool).at[v_x_idx].set(True)

    # Boundary adjacencies materialized directly in bf16 at data-prep time
    # (0/1 is exact in bf16; halves adjacency HBM traffic, no wrapper cast).
    ADJ_DTYPE = jnp.bfloat16

    # Edges: graph 0 has 6, graph 1 has 4.
    edges_g0 = [(0, 1), (1, 2), (2, 3), (3, 4), (4, 5), (5, 6)]
    edges_g1 = [(0, 1), (1, 2), (2, 3), (3, 4)]
    e_adj = jnp.zeros((B, NE_MAX, NV_MAX), dtype=ADJ_DTYPE)
    for i, (u, w) in enumerate(edges_g0):
        e_adj = e_adj.at[0, i, u].set(1.0).at[0, i, w].set(1.0)
    for i, (u, w) in enumerate(edges_g1):
        e_adj = e_adj.at[1, i, u].set(1.0).at[1, i, w].set(1.0)
    e_batch = jnp.array([0] * len(edges_g0) + [1] * len(edges_g1), dtype=jnp.int32)
    e_pos = jnp.concatenate(
        [jnp.arange(len(edges_g0)), jnp.arange(len(edges_g1))]).astype(jnp.int32)
    e_x_idx = (e_batch, e_pos)

    # 2-cells: graph 0 has 2, graph 1 has 1.
    cells_g0 = [(0, 1, 2), (2, 3, 4)]
    cells_g1 = [(0, 1, 2, 3)]
    c_adj = jnp.zeros((B, NC_MAX, NE_MAX), dtype=ADJ_DTYPE)
    for i, es in enumerate(cells_g0):
        for e in es:
            c_adj = c_adj.at[0, i, e].set(1.0)
    for i, es in enumerate(cells_g1):
        for e in es:
            c_adj = c_adj.at[1, i, e].set(1.0)
    c_batch = jnp.array([0] * len(cells_g0) + [1] * len(cells_g1), dtype=jnp.int32)
    c_pos = jnp.concatenate(
        [jnp.arange(len(cells_g0)), jnp.arange(len(cells_g1))]).astype(jnp.int32)
    c_x_idx = (c_batch, c_pos)

    # Run the Pallas-backed forward.
    vx, ex, cx = embed_ve_with_reduce_forward(
        v_table, v_x, v_x_mask, v_x_idx, e_adj, e_x_idx, c_adj, c_x_idx)
    jax.block_until_ready((vx, ex, cx))

    # Pure-JAX reference (same semantics as the PyTorch forward, all f32).
    ref_vx = v_table[v_x[:, 0]]
    ref_dense_vx = jnp.zeros((B, NV_MAX, F), jnp.float32).at[v_x_idx].set(ref_vx)
    e_adj_f32 = e_adj.astype(jnp.float32)
    c_adj_f32 = c_adj.astype(jnp.float32)
    ref_reduced = jnp.einsum("bij,bjf->bif", e_adj_f32, ref_dense_vx)
    ref_ex = ref_reduced[e_x_idx]
    ref_cx = (jnp.einsum("bij,bjf->bif", c_adj_f32, ref_reduced) / 2.0)[c_x_idx]

    assert jnp.allclose(vx, ref_vx, atol=1e-5), "vertex embeddings mismatch"
    assert jnp.allclose(ex, ref_ex, atol=1e-5), "edge features mismatch"
    assert jnp.allclose(cx, ref_cx, atol=1e-5), "cell features mismatch"

    print("KERNEL_OK")
</pallas_src>

<mosaic_0001>
module attributes {stable_mosaic.version = 11 : i64} {
  func.func @_fused_reduce_kernel(%arg0: i32, %arg1: memref<1x8x8xbf16, #tpu.memory_space<vmem>>, %arg2: memref<1x8x128xf32, #tpu.memory_space<vmem>>, %arg3: memref<1x4x8xbf16, #tpu.memory_space<vmem>>, %arg4: memref<1x8x128xf32, #tpu.memory_space<vmem>>, %arg5: memref<1x4x128xf32, #tpu.memory_space<vmem>>) attributes {dimension_semantics = [#tpu.dimension_semantics<parallel>], iteration_bounds = array<i64: 2>, scalar_prefetch = 0 : i64, scratch_operands = 0 : i64, tpu.core_type = #tpu.core_type<tc>, window_params = [{transform_indices = @transform_0, window_bounds = array<i64: 1, 8, 8>}, {transform_indices = @transform_1, window_bounds = array<i64: 1, 8, 128>}, {transform_indices = @transform_2, window_bounds = array<i64: 1, 4, 8>}, {transform_indices = @transform_3, window_bounds = array<i64: 1, 8, 128>}, {transform_indices = @transform_4, window_bounds = array<i64: 1, 4, 128>}]} {
    %c0 = arith.constant 0 : index
    %c0_0 = arith.constant 0 : index
    %c0_1 = arith.constant 0 : index
    %0 = vector.load %arg2[%c0, %c0_0, %c0_1] : memref<1x8x128xf32, #tpu.memory_space<vmem>>, vector<1x8x128xf32>
    %c0_2 = arith.constant 0 : index
    %c0_3 = arith.constant 0 : index
    %c0_4 = arith.constant 0 : index
    %1 = vector.load %arg1[%c0_2, %c0_3, %c0_4] : memref<1x8x8xbf16, #tpu.memory_space<vmem>>, vector<1x8x8xbf16>
    %2 = arith.extf %1 : vector<1x8x8xbf16> to vector<1x8x8xf32>
    "tpu.trace_start"() <{level = 10 : i32, message = "bij,bjf->bif"}> : () -> ()
    %cst = arith.constant dense<0.000000e+00> : vector<1x8x128xf32>
    %3 = tpu.matmul %2, %0, %cst {dimension_numbers = #tpu.dot_dimension_numbers<[2], [1], [1], [2], [0, 0, 0, 1, 1, 2], [0], [0]>} : vector<1x8x8xf32>, vector<1x8x128xf32>, vector<1x8x128xf32> -> vector<1x8x128xf32>
    "tpu.trace_stop"() : () -> ()
    %c0_5 = arith.constant 0 : index
    %c0_6 = arith.constant 0 : index
    %c0_7 = arith.constant 0 : index
    %4 = vector.load %arg4[%c0_5, %c0_6, %c0_7] : memref<1x8x128xf32, #tpu.memory_space<vmem>>, vector<1x8x128xf32>
    tpu.vector_store %arg4[%c0_5, %c0_6, %c0_7], %3 {strides = array<i32>} : memref<1x8x128xf32, #tpu.memory_space<vmem>>, vector<1x8x128xf32>,
    %c0_8 = arith.constant 0 : index
    %c0_9 = arith.constant 0 : index
    %c0_10 = arith.constant 0 : index
    %5 = vector.load %arg3[%c0_8, %c0_9, %c0_10] : memref<1x4x8xbf16, #tpu.memory_space<vmem>>, vector<1x4x8xbf16>
    %6 = arith.extf %5 : vector<1x4x8xbf16> to vector<1x4x8xf32>
    "tpu.trace_start"() <{level = 10 : i32, message = "bij,bjf->bif"}> : () -> ()
    %cst_11 = arith.constant dense<0.000000e+00> : vector<1x4x128xf32>
    %7 = tpu.matmul %6, %3, %cst_11 {dimension_numbers = #tpu.dot_dimension_numbers<[2], [1], [1], [2], [0, 0, 0, 1, 1, 2], [0], [0]>} : vector<1x4x8xf32>, vector<1x8x128xf32>, vector<1x4x128xf32> -> vector<1x4x128xf32>
    "tpu.trace_stop"() : () -> ()
    %cst_12 = arith.constant 5.000000e-01 : f32
    %8 = vector.broadcast %cst_12 : f32 to vector<1x4x128xf32>
    %9 = arith.mulf %7, %8 : vector<1x4x128xf32>
    %c0_13 = arith.constant 0 : index
    %c0_14 = arith.constant 0 : index
    %c0_15 = arith.constant 0 : index
    %10 = vector.load %arg5[%c0_13, %c0_14, %c0_15] : memref<1x4x128xf32, #tpu.memory_space<vmem>>, vector<1x4x128xf32>
    tpu.vector_store %arg5[%c0_13, %c0_14, %c0_15], %9 {strides = array<i32>} : memref<1x4x128xf32, #tpu.memory_space<vmem>>, vector<1x4x128xf32>,
    return
  }
  func.func @transform_0(%arg0: i32) -> (i32, i32, i32) {
    %c0_i32 = arith.constant 0 : i32
    %c0_i32_0 = arith.constant 0 : i32
    %c0_i32_1 = arith.constant 0 : i32
    return %arg0, %c0_i32, %c0_i32_0 : i32, i32, i32
  }
  func.func @transform_1(%arg0: i32) -> (i32, i32, i32) {
    %c0_i32 = arith.constant 0 : i32
    %c0_i32_0 = arith.constant 0 : i32
    %c0_i32_1 = arith.constant 0 : i32
    return %arg0, %c0_i32, %c0_i32_0 : i32, i32, i32
  }
  func.func @transform_2(%arg0: i32) -> (i32, i32, i32) {
    %c0_i32 = arith.constant 0 : i32
    %c0_i32_0 = arith.constant 0 : i32
    %c0_i32_1 = arith.constant 0 : i32
    return %arg0, %c0_i32, %c0_i32_0 : i32, i32, i32
  }
  func.func @transform_3(%arg0: i32) -> (i32, i32, i32) {
    %c0_i32 = arith.constant 0 : i32
    %c0_i32_0 = arith.constant 0 : i32
    %c0_i32_1 = arith.constant 0 : i32
    return %arg0, %c0_i32, %c0_i32_0 : i32, i32, i32
  }
  func.func @transform_4(%arg0: i32) -> (i32, i32, i32) {
    %c0_i32 = arith.constant 0 : i32
    %c0_i32_0 = arith.constant 0 : i32
    %c0_i32_1 = arith.constant 0 : i32
    return %arg0, %c0_i32, %c0_i32_0 : i32, i32, i32
  }
}

</mosaic_0001>

<bundles_post_ra>
// kernel: tpu_custom_call.1
= control target key start
LH: loop header
LB: loop body
LE: loop exit
PB: predicated region body
PF: predicated region fallthrough
CT: control target
= control target key end

     0   :  { %s1037_s0 = inlined_call_operand.hbm [shape: bf16[2,8,8], index: 0, kind: input, shape index: {}]   ;;  %s1038_s1 = inlined_call_operand.hbm [shape: f32[2,8,128], index: 1, kind: input, shape index: {}]   ;;  %s1039_s2 = inlined_call_operand.hbm [shape: bf16[2,4,8], index: 2, kind: input, shape index: {}]   ;;  %s1040_s3 = inlined_call_operand.hbm [shape: f32[2,8,128], index: 3, kind: output, shape index: {0}]   ;;  %s1041_s4 = inlined_call_operand.hbm [shape: f32[2,4,128], index: 4, kind: output, shape index: {1}]  }
   0x1   :  { %1043 = sst [smem:[#allocation17_spill]] %s1038_s1 }
   0x2   :  { %10 = vsyncpa [#allocation3], 0 }
   0x3   :  { %12 = vsyncpa [#allocation3 + $0x1], 0 }
   0x4   :  { %13 = vsyncpa [#allocation6], 0 }
   0x5   :  { %15 = vsyncpa [#allocation6 + $0x1], 0 }
   0x6   :  { %16 = vsyncpa [#allocation4], 0 }
   0x7   :  { %18 = vsyncpa [#allocation4 + $0x1], 0 }
   0x8   :  { %19 = vsyncpa [#allocation10], 0 }
   0x9   :  { %21 = vsyncpa [#allocation10 + $0x1], 0  ;;  %s840_s15 = smov 0   ;;  %s842_s16 = smov 0  }
   0xa   :  { %s844_s17 = smov 0   ;;  %s846_s18 = smov 0  }
   0xb LB: > { %1044 = sst [smem:[#allocation15_spill]] %s809_s17  ;;  %s861_s19 = sadd.s32 4294967295, %s813_s18   ;;  %s813_s18 = sphi %s846_s18, %s1057_s18   ;;  %s809_s17 = sphi %s844_s17, %s1056_s17   ;;  %s805_s16 = sphi %s842_s16, %s1055_s16   ;;  %s801_s15 = sphi %s840_s15, %s1054_s15  }
   0xc   : > { %s537_s20 = sadd.s32 4294967294, %s813_s18   ;;  %s865_s21 = sadd.s32 1, %s813_s18  }
   0xd   : > { %s34_s22 = sadd.s32 1, %s809_s17  ;;  %s31_s23 = ssub.s32 %s813_s18, %s865_s21 }
   0xe   : > { %p41_p0 = scmp.ne.s32.totalorder %s809_s17, %s805_s16  ;;  %p32_p1 = scmp.eq.s32.totalorder %s31_s23, 0 }
   0xf   : > { %p42_p2 = scmp.eq.s32.totalorder %s813_s18, 0  ;;  %p47_p3 = scmp.ne.s32.totalorder %s805_s16, %s801_s15 }
  0x10   : > { %p48_p4 = scmp.eq.s32.totalorder %s861_s19, 0  ;;  %p123_p7 = scmp.eq.s32.totalorder %s861_s19, 1 }
  0x11   : > { %s877_s24 = scalar_select %p32_p1, %s809_s17, %s34_s22  }
  0x12   : > { %p43_p5 = por %p42_p2, %p41_p0  ;;  %p879_p6 = por %p48_p4, %p47_p3 }
  0x13   : > { %1045 = sst [smem:[#allocation16_spill]] %s877_s24  ;;  %p129_p8 = scmp.eq.s32.totalorder %s537_s20, 1 }
  0x14   : > { %p539_p9 = scmp.ge.s32.totalorder %s813_s18, 2  ;;  %p587_p10 = scmp.lt.s32.totalorder %s813_s18, 2 }
  0x15   : > { %p886_p11 = por %p123_p7, %p41_p0  ;;  %p890_p12 = por %p129_p8, %p47_p3 }
  0x16   : > { %s895_s28 = sand.u32 1, %s809_s17   ;;  %p897_p13 = pnand %p587_p10, %p43_p5 }
  0x17   : > { %s194_s30 = sand.u32 1, %s813_s18   ;;  %s542_s5 = sshll.u32 %s895_s28, 3 }
  0x18   : > { %s543_s6 = sshll.u32 %s813_s18, 3  ;;  %s1050_s1 = sld [smem:[#allocation17_spill]] }
  0x19   : > { %s198_s10 = scalar_lea.vmem [#allocation5], %s542_s5  ;;  %p546_p0 = scmp.ge.s32.totalorder %s813_s18, 1 }
  0x1a   : > { %s206_s11 = sshll.u32 %s198_s10, 4  ;;  %s908_s13 = scalar_lea.sflag [#allocation6], %s194_s30  ;;  %s207_s11 = int_to_ptr.vmem [resolvable:$true] %s206_s11 }
  0x1b   : > { %p625_p2 = pneg %p897_p13 }
  0x1e   : > { %s202_s9 = scalar_lea.hbm %s1050_s1, %s543_s6  ;;  %s628_s5 = scalar_lea.hbm %s1050_s1, 16 }
  0x1f   : > { %s204_s12 = sshll.u32 %s202_s9, 4  ;;  %s205_s12 = int_to_ptr.hbm [resolvable:$true] %s204_s12 }
  0x20   : > { %s621_s14 = sshra.s32 %s205_s12, 4  ;;  %s622_s14 = int_to_ptr.hbm [resolvable:$true] %s621_s14 }
  0x21   : > { %s623_s20 = scalar_lea.hbm %s622_s14, 8  ;;  %p629_p5 = scmp.lt.s32.totalorder %s622_s14, %s1050_s1 }
  0x22   : > { %p624_p1 = scmp.ne.s32.totalorder %s622_s14, %s623_s20  ;;  %p630_p7 = scmp.lt.s32.totalorder %s628_s5, %s623_s20 }
  0x24   : > { %p626_p3 = pnand %p625_p2, %p624_p1  ;;  %p631_p8 = por %p630_p7, %p629_p5 }
  0x26   : > { %p627_p4 = pneg %p626_p3 }
  0x28   : > { %p632_p10 = pnand %p631_p8, %p627_p4 }
  0x2a   : > { %635 = shalt.err (!%p632_p10)
}
  0x2b   : > { %576 = dma.hbm_to_vmem [thread:$0]  (!%p897_p13), %s205_s12, 128, %s207_s11, %s908_s13  }
  0x2c   : > { %p230_p1 = scmp.lt.s32.totalorder %s813_s18, 3  ;;  %s540_s30 = sshll.u32 %s895_s28, 2 }
  0x2d   : > { %s541_s8 = sshll.u32 %s813_s18, 2  ;;  %s179_s22 = scalar_lea.vmem [#allocation2], %s540_s30 }
  0x2e   : > { %p929_p3 = pnand %p546_p0, %p230_p1  ;;  %s183_s20 = scalar_lea.hbm %s1037_s0, %s541_s8 }
  0x2f   : > { %s187_s23 = sshll.u32 %s179_s22, 4  ;;  %s185_s5 = sshll.u32 %s183_s20, 4  ;;  %s188_s23 = int_to_ptr.vmem [resolvable:$true] %s187_s23  ;;  %s186_s5 = int_to_ptr.hbm [resolvable:$true] %s185_s5 }
  0x30   : > { %s544_s6 = sshll.u32 %s895_s28, 1  ;;  %s176_s11 = scalar_lea.sflag [#allocation3], %s895_s28 }
  0x31   : > { %s651_s12 = sshra.s32 %s186_s5, 4  ;;  %s658_s10 = scalar_lea.hbm %s1037_s0, 8  ;;  %s652_s12 = int_to_ptr.hbm [resolvable:$true] %s651_s12 }
  0x32   : > { %s653_s7 = scalar_lea.hbm %s652_s12, 4  ;;  %p659_p7 = scmp.lt.s32.totalorder %s652_s12, %s1037_s0 }
  0x33   : > { %p654_p4 = scmp.ne.s32.totalorder %s652_s12, %s653_s7  ;;  %p660_p8 = scmp.lt.s32.totalorder %s658_s10, %s653_s7 }
  0x35   : > { %p656_p0 = pnand %p654_p4, %p625_p2  ;;  %p661_p10 = por %p660_p8, %p659_p7 }
  0x37   : > { %p657_p5 = pneg %p656_p0 }
  0x39   : > { %p662_p1 = pnand %p661_p10, %p657_p5 }
  0x3b   : > { %665 = shalt.err (!%p662_p1)
}
  0x3c   : > { %573 = dma.hbm_to_vmem [thread:$0]  (!%p897_p13), %s186_s5, 64, %s188_s23, %s176_s11  }
  0x3d   : > { %s545_s28 = sshll.u32 %s813_s18, 1  ;;  %s217_s1 = scalar_lea.vmem [#allocation7], %s544_s6 }
  0x3e   : > { %s221_s22 = scalar_lea.hbm %s1039_s2, %s545_s28  ;;  %s225_s24 = sshll.u32 %s217_s1, 4  ;;  %s226_s24 = int_to_ptr.vmem [resolvable:$true] %s225_s24 }
  0x3f   : > { %s223_s17 = sshll.u32 %s221_s22, 4  ;;  %s688_s5 = scalar_lea.hbm %s1039_s2, 4  ;;  %s224_s17 = int_to_ptr.hbm [resolvable:$true] %s223_s17 }
  0x40   : > { %s681_s12 = sshra.s32 %s224_s17, 4  ;;  %s682_s12 = int_to_ptr.hbm [resolvable:$true] %s681_s12 }
  0x41   : > { %s683_s7 = scalar_lea.hbm %s682_s12, 2  ;;  %p689_p7 = scmp.lt.s32.totalorder %s682_s12, %s1039_s2 }
  0x42   : > { %p684_p4 = scmp.ne.s32.totalorder %s682_s12, %s683_s7  ;;  %p690_p8 = scmp.lt.s32.totalorder %s688_s5, %s683_s7 }
  0x44   : > { %p686_p0 = pnand %p684_p4, %p625_p2  ;;  %p691_p10 = por %p690_p8, %p689_p7 }
  0x46   : > { %p687_p5 = pneg %p686_p0 }
  0x48   : > { %p692_p1 = pnand %p691_p10, %p687_p5 }
  0x4a   : > { %695 = shalt.err (!%p692_p1)
}
  0x4b   : > { %579 = dma.hbm_to_vmem [thread:$0]  (!%p897_p13), %s224_s17, 32, %s226_s24, %s908_s13  }
  0x4c   : > { %234 = sbr.rel (%p929_p3) target bundleno = 346 (0x15a), region = 32  ;;  %s968_s6 = sand.u32 (!%p929_p3), 1, %s805_s16  }
  0x4d   : > { %s547_s30 = sshll.u32 (!%p929_p3), %s968_s6, 2  ;;  %s237_s28 = scalar_lea.sflag (!%p929_p3), [#allocation3], %s968_s6 }
  0x4e   : > { %s240_s14 = scalar_lea.vmem (!%p929_p3), [#allocation2], %s547_s30 }
  0x51   : > { %784 = dma.done.wait (%p879_p6), %s237_s28, 64  }
  0x52   : > { %786 = vsyncadd (%p879_p6), %s237_s28, 4294967232  ;;  %s246_s17 = sand.u32 1, %s861_s19   ;;  %s548_s29 = sshll.u32 %s968_s6, 3 }
  0x53   : > { %s247_s13 = scalar_lea.sflag [#allocation6], %s246_s17  ;;  %s250_s9 = scalar_lea.vmem [#allocation5], %s548_s29 }
  0x54   : > { %788 = dma.done.wait (%p879_p6), %s247_s13, 160  }
  0x55   : > { %790 = vsyncadd (%p879_p6), %s247_s13, 4294967136  ;;  %v301_v0 = vld [vmem:[%s250_s9] sm:$0xff]  ;;  %v302_v1 = vld [vmem:[%s240_s14] sm:$0xf]  ;;  %vm304_vm0 = vcmask 64512   ;;  %s549_s20 = sshll.u32 %s968_s6, 1 }
  0x56   : > { %323 = vmatpush.msra.mxu0 %v301_v0  ;;  %v303_v2 = vunpack.c.l.bf16 %v302_v1  ;;  %s260_s22 = scalar_lea.vmem [#allocation7], %s549_s20  ;;  %s293_s1 = scalar_lea.vmem [#allocation8], %s548_s29 }
  0x57   : > { %v329_v3 = vld [vmem:[%s260_s22] sm:$0x3]  ;;  %s374_s24 = sshll.u32 %s293_s1, 4  ;;  %s556_s12 = sshll.u32 %s861_s19, 3  ;;  %s375_s24 = int_to_ptr.vmem [resolvable:$true] %s374_s24 }
  0x58   : > { %552 = vmatmul.msk.f32.vlgmr.msra.gmra.mxu0 %vm304_vm0, %v303_v2  ;;  %v330_v4 = vunpack.c.l.bf16 %v329_v3  ;;  %s372_s10 = scalar_lea.hbm %s1040_s3, %s556_s12  ;;  %s357_s5 = scalar_lea.sflag [#allocation4], %s968_s6 }
  0x59   : > { %s376_s23 = sshll.u32 %s372_s10, 4  ;;  %s731_s17 = scalar_lea.hbm %s1040_s3, 16  ;;  %s377_s23 = int_to_ptr.hbm [resolvable:$true] %s376_s23 }
  0x5a   : > { %s725_s11 = sshra.s32 %s377_s23, 4  ;;  %s726_s11 = int_to_ptr.hbm [resolvable:$true] %s725_s11 }
  0x5b   : > { %s727_s8 = scalar_lea.hbm %s726_s11, 8  ;;  %p732_p3 = scmp.lt.s32.totalorder %s726_s11, %s1040_s3 }
  0x5c   : > { %p728_p6 = scmp.ne.s32.totalorder %s726_s11, %s727_s8  ;;  %p733_p4 = scmp.lt.s32.totalorder %s731_s17, %s727_s8 }
  0x5e   : > { %p729_p13 = pnand %p728_p6, %p886_p11  ;;  %p734_p0 = por %p733_p4, %p732_p3 }
  0x60   : > { %p730_p2 = pneg %p729_p13 }
  0x62   : > { %p735_p5 = pnand %p734_p0, %p730_p2 }
  0xd5   : > { %v325_v5 = vpop.f32.mrf.mxu0 }
  0xd6   : > { %328 = vst [vmem:[%s293_s1] sm:$0xff] %v325_v5  ;;  %349 = vmatpush.msra.mxu1 %v325_v5 }
  0xd7   : > { %553 = vmatmul.msk.f32.vlgmr.msra.gmra.mxu1 %vm304_vm0, %v330_v4 }
  0xd8   : > { %738 = shalt.err (!%p735_p5)
}
  0xd9   : > { %566 = dma.vmem_to_hbm [thread:$0]  (%p886_p11), %s375_s24, 128, %s377_s23, %s357_s5  }
  0xda   : > { %s557_s9 = sshll.u32 %s861_s19, 2  ;;  %s300_s12 = scalar_lea.vmem [#allocation9], %s547_s30 }
  0xdb   : > { %s386_s1 = scalar_lea.hbm %s1041_s4, %s557_s9  ;;  %s388_s25 = sshll.u32 %s300_s12, 4  ;;  %s389_s25 = int_to_ptr.vmem [resolvable:$true] %s388_s25 }
  0xdc   : > { %s390_s7 = sshll.u32 %s386_s1, 4  ;;  %s362_s10 = scalar_lea.sflag [#allocation10], %s968_s6  ;;  %s391_s7 = int_to_ptr.hbm [resolvable:$true] %s390_s7 }
  0xdd   : > { %s753_s11 = sshra.s32 %s391_s7, 4  ;;  %s759_s23 = scalar_lea.hbm %s1041_s4, 8  ;;  %s754_s11 = int_to_ptr.hbm [resolvable:$true] %s753_s11 }
  0xde   : > { %s755_s8 = scalar_lea.hbm %s754_s11, 4  ;;  %p760_p1 = scmp.lt.s32.totalorder %s754_s11, %s1041_s4 }
  0xdf   : > { %p756_p7 = scmp.ne.s32.totalorder %s754_s11, %s755_s8  ;;  %p761_p6 = scmp.lt.s32.totalorder %s759_s23, %s755_s8 }
  0xe1   : > { %p757_p8 = pnand %p756_p7, %p886_p11  ;;  %p762_p13 = por %p761_p6, %p760_p1 }
  0xe3   : > { %p758_p10 = pneg %p757_p8 }
  0xe5   : > { %p763_p2 = pnand %p762_p13, %p758_p10 }
 0x154   : > { %v351_v6 = vpop.f32.mrf.mxu1 }
 0x155   : > { %v354_v7 = vmul.f32 0.5, %v351_v6 }
 0x157   : > { %355 = vst [vmem:[%s300_s12] sm:$0xf] %v354_v7 }
 0x158   : > { %766 = shalt.err (!%p763_p2)
}
 0x159   : > { %567 = dma.vmem_to_hbm [thread:$0]  (%p886_p11), %s389_s25, 64, %s391_s7, %s362_s10  }
 0x15a PF: > { %s402_s6 = sand.u32 1, %s801_s15   ;;  %p581_p3 = pnand %p539_p9, %p890_p12 }
 0x15b   : > { %s403_s28 = scalar_lea.sflag [#allocation4], %s402_s6 }
 0x15c   : > { %p582_p4 = pneg %p581_p3 }
 0x15e   : > { %792 = dma.done.wait (%p582_p4), %s403_s28, 128  }
 0x15f   : > { %794 = vsyncadd (%p582_p4), %s403_s28, 4294967168  ;;  %s413_s14 = scalar_lea.sflag [#allocation10], %s402_s6 }
 0x160   : > { %796 = dma.done.wait (%p582_p4), %s413_s14, 64  }
 0x161   : > { %798 = vsyncadd (%p582_p4), %s413_s14, 4294967232  ;;  %s1052_s17 = sld [smem:[#allocation15_spill]]  ;;  %p24_p11 = scmp.ge.s32.totalorder %s865_s21, 4  }
 0x162   : > { %s1053_s26 = sld [smem:[#allocation16_spill]]  ;;  %s1054_s15 = smov %s805_s16 }
 0x163   : > { %s1057_s18 = smov %s865_s21 }
 0x164   :  { %26 = sbr.rel (!%p24_p11) target bundleno = 11 (0xb), region = 118 }
 0x167   : > { %s1055_s16 = smov %s1052_s17 }
 0x168   : > { %s1056_s17 = smov %s1053_s26 }
 0x169   :  { %419 = vsyncpa [#allocation3], 1 }
 0x16a   :  { %421 = vsyncpa [#allocation3 + $0x1], 1 }
 0x16b   :  { %422 = vsyncpa [#allocation6], 1 }
 0x16c   :  { %424 = vsyncpa [#allocation6 + $0x1], 1 }
 0x16d   :  { %425 = vsyncpa [#allocation4], 1 }
 0x16e   :  { %427 = vsyncpa [#allocation4 + $0x1], 1 }
 0x16f   :  { %428 = vsyncpa [#allocation10], 1 }
 0x170   :  { %430 = vsyncpa [#allocation10 + $0x1], 1 }

</bundles_post_ra>
